<compile_context>
chip_gen: v7x
topology: tpu7x:2x2x1
jax: 0.10.0
libtpu: 0.0.40
codegen_flags: <defaults>
</compile_context>

<pallas_src>
import jax
import jax.numpy as jnp
from jax.experimental import pallas as pl
from jax.experimental.pallas import tpu as pltpu

_EPS = 1e-5            # PyTorch BatchNorm1d default eps
_LANE = 128
_MIN_SPLIT_ROWS = 512  # only split a single-tile batch across 2 cores if B >= this


def _critic_kernel(x_ref, win_ref, bin_ref, w1_ref, b1_ref, w2_ref, b2_ref,
                   w3r_ref, b3_ref, o_ref):
    cdt = win_ref.dtype  # MXU operand dtype (bf16 or f32); accumulation is always f32

    # fused state||action input layer (block-diagonal weight) + tanh -> [bb, 256]
    h = jnp.dot(x_ref[...].astype(cdt), win_ref[...],
                preferred_element_type=jnp.float32) + bin_ref[...]
    h = jnp.tanh(h)

    # Linear(256,256) + LeakyReLU(0.2); BatchNorm1d(256) folded into w2/b2
    h = jnp.dot(h.astype(cdt), w1_ref[...],
                preferred_element_type=jnp.float32) + b1_ref[...]
    h = jnp.maximum(h, 0.2 * h)

    # Linear(256,64) (zero-padded to 128 lanes) + tanh; Dropout = identity (eval);
    # BatchNorm1d(64) folded into w3/b3
    h = jnp.dot(h.astype(cdt), w2_ref[...],
                preferred_element_type=jnp.float32) + b2_ref[...]
    h = jnp.tanh(h)                                            # [bb, 128]

    # Linear(64,1): VPU broadcast-multiply + XLU lane reduction (no MXU pass),
    # directly yielding the narrow (bb, 1) output block.
    out = jnp.sum(h * w3r_ref[...], axis=-1, keepdims=True) + b3_ref[...]
    o_ref[...] = out.astype(o_ref.dtype)                       # [bb, 1]


def _round_up(x, m):
    return ((x + m - 1) // m) * m


def _bn_fold(gamma, beta, mean, var):
    scale = gamma / jnp.sqrt(var + _EPS)   # [1, n]
    shift = beta - mean * scale            # [1, n]
    return scale, shift


def atlas_knob_critic_forward(state, action, params, *, block_b=1024, use_bf16=True):
    """state: [B, state_num] f32, action: [B, action_num] f32 -> [B, 1] f32."""
    B, state_num = state.shape
    _, action_num = action.shape
    din = state_num + action_num

    ws, bs = params["state_input"]
    wa, ba = params["action_input"]
    w1, b1 = params["l1"]
    w2, b2 = params["l2"]
    w3, b3 = params["l3"]
    g1, be1, rm1, rv1 = params["bn1"]
    g2, be2, rm2, rv2 = params["bn2"]

    # ---- merge the two input layers into one block-diagonal matmul ----
    w_in = jnp.zeros((din, 2 * _LANE), jnp.float32)
    w_in = w_in.at[:state_num, :_LANE].set(ws).at[state_num:, _LANE:].set(wa)
    b_in = jnp.concatenate([bs, ba], axis=1)                   # [1, 256]

    # ---- fold eval-mode BatchNorms into the following Linears ----
    s1, t1 = _bn_fold(g1, be1, rm1, rv1)                       # applied before l2
    s2, t2 = _bn_fold(g2, be2, rm2, rv2)                       # applied before l3
    w2f = s1.reshape(-1, 1) * w2                               # [256, 64]
    b2f = b2 + t1 @ w2                                         # [1, 64]
    w3f = s2.reshape(-1, 1) * w3                               # [64, 1]
    b3f = b3 + t2 @ w3                                         # [1, 1]

    # zero-pad the 64-wide hidden to 128 lanes; the last layer becomes a
    # [1, 128] row (zeros past col 64), used by the in-kernel VPU reduction.
    h2 = w2.shape[1]                                           # 64
    w2p = jnp.zeros((w2f.shape[0], _LANE), jnp.float32).at[:, :h2].set(w2f)
    b2p = jnp.zeros((1, _LANE), jnp.float32).at[:, :h2].set(b2f)
    w3r = jnp.zeros((1, _LANE), jnp.float32).at[:, :h2].set(w3f.T)   # stays f32 (VPU)

    mm_dtype = jnp.bfloat16 if use_bf16 else jnp.float32
    win_c, w1_c, w2_c = (w.astype(mm_dtype) for w in (w_in, w1, w2p))

    # ---- batch tiling: big sublane-aligned tiles; pad B instead of asserting ----
    bb = _round_up(min(block_b, _round_up(B, 8)), 8)
    # v7x has 2 TensorCores: when the whole batch would fit in one tile but is
    # big enough to be worth splitting, cap the tile so the grid has >= 2 steps.
    if B >= _MIN_SPLIT_ROWS and B <= bb:
        bb = _round_up(pl.cdiv(B, 2), 8)
    Bp = _round_up(B, bb)
    grid = (Bp // bb,)

    x = jnp.concatenate([state, action], axis=1)               # [B, din]
    if Bp != B:
        x = jnp.pad(x, ((0, Bp - B), (0, 0)))

    # weights/biases: same block every step (loaded once, resident in VMEM).
    # (single-buffering them via pipeline_mode would save ~240 KB VMEM; skipped
    #  here for portability since it is well under every generation's budget)
    resident = lambda i: (0, 0)

    # VMEM budget from the actual tile (double-buffered activations + resident
    # weights + intermediates headroom), clamped to [32 MiB, 64 MiB(v7x)].
    est = (2 * bb * _LANE * 4           # input block (lane-padded in VMEM), x2 buffers
           + 2 * bb * _LANE * 4         # (bb,1) output block is lane-padded in VMEM, x2
           + 6 * bb * 2 * _LANE * 4     # live f32 intermediates headroom
           + (1 << 20))                 # weights + misc
    vmem_limit = int(min(max(est, 32 << 20), 64 << 20))

    out = pl.pallas_call(
        _critic_kernel,
        out_shape=jax.ShapeDtypeStruct((Bp, 1), jnp.float32),
        grid_spec=pltpu.PrefetchScalarGridSpec(
            num_scalar_prefetch=0,
            grid=grid,
            in_specs=[
                pl.BlockSpec((bb, din), lambda i: (i, 0)),
                pl.BlockSpec(win_c.shape, resident), pl.BlockSpec(b_in.shape, resident),
                pl.BlockSpec(w1_c.shape, resident), pl.BlockSpec(b1.shape, resident),
                pl.BlockSpec(w2_c.shape, resident), pl.BlockSpec(b2p.shape, resident),
                pl.BlockSpec(w3r.shape, resident), pl.BlockSpec(b3f.shape, resident),
            ],
            out_specs=pl.BlockSpec((bb, 1), lambda i: (i, 0)),
        ),
        compiler_params=pltpu.CompilerParams(
            dimension_semantics=("parallel",),
            vmem_limit_bytes=vmem_limit),
    )(x, win_c, b_in, w1_c, b1, w2_c, b2p, w3r, b3f)

    return out[:B]


def init_params(key, state_num, action_num):
    """Mirror _init_weights: W ~ N(0, 0.01), b ~ U(-0.1, 0.1), stored as [in, out].
    BatchNorm stats/affine are randomized so the eval-mode BN fold is exercised."""
    def linear(k, din, dout):
        kw, kb = jax.random.split(k)
        w = 0.01 * jax.random.normal(kw, (din, dout), jnp.float32)
        b = jax.random.uniform(kb, (1, dout), jnp.float32, minval=-0.1, maxval=0.1)
        return w, b

    def bnorm(k, n):
        kg, kb, km, kv = jax.random.split(k, 4)
        gamma = jax.random.uniform(kg, (1, n), jnp.float32, minval=0.5, maxval=1.5)
        beta = jax.random.uniform(kb, (1, n), jnp.float32, minval=-0.1, maxval=0.1)
        rmean = 0.1 * jax.random.normal(km, (1, n), jnp.float32)
        rvar = jax.random.uniform(kv, (1, n), jnp.float32, minval=0.5, maxval=1.5)
        return gamma, beta, rmean, rvar

    keys = jax.random.split(key, 7)
    return {
        "state_input": linear(keys[0], state_num, 128),
        "action_input": linear(keys[1], action_num, 128),
        "l1": linear(keys[2], 256, 256),
        "bn1": bnorm(keys[3], 256),
        "l2": linear(keys[4], 256, 64),
        "bn2": bnorm(keys[5], 64),
        "l3": linear(keys[6], 64, 1),
    }


def _reference_forward(state, action, params):
    """Pure-JAX eval-mode reference matching the PyTorch module."""
    ws, bs = params["state_input"]
    wa, ba = params["action_input"]
    w1, b1 = params["l1"]
    w2, b2 = params["l2"]
    w3, b3 = params["l3"]
    g1, be1, rm1, rv1 = params["bn1"]
    g2, be2, rm2, rv2 = params["bn2"]

    s = jnp.tanh(state @ ws + bs)
    a = jnp.tanh(action @ wa + ba)
    h = jnp.concatenate([s, a], axis=1)
    h = h @ w1 + b1
    h = jnp.where(h > 0, h, 0.2 * h)                       # LeakyReLU(0.2)
    h = (h - rm1) / jnp.sqrt(rv1 + _EPS) * g1 + be1        # BatchNorm1d(256), eval
    h = jnp.tanh(h @ w2 + b2)                              # Dropout(0.3) = identity in eval
    h = (h - rm2) / jnp.sqrt(rv2 + _EPS) * g2 + be2        # BatchNorm1d(64), eval
    return h @ w3 + b3


if __name__ == "__main__":
    state_num, action_num, batch = 24, 12, 16

    key = jax.random.PRNGKey(0)
    key, ks, ka = jax.random.split(key, 3)
    state = jax.random.normal(ks, (batch, state_num), dtype=jnp.float32)
    action = jax.random.normal(ka, (batch, action_num), dtype=jnp.float32)
    params = init_params(key, state_num, action_num)

    ref = _reference_forward(state, action, params)

    # f32 MXU-operand path (tight check)
    out_f32 = jax.block_until_ready(
        atlas_knob_critic_forward(state, action, params, use_bf16=False))
    assert out_f32.shape == (batch, 1)
    assert jnp.allclose(out_f32, ref, atol=5e-3, rtol=5e-3), "f32 kernel mismatch"

    # bf16 MXU-operand path (fast path on v5e/v6e/v7x, looser tolerance)
    out_bf16 = jax.block_until_ready(
        atlas_knob_critic_forward(state, action, params, use_bf16=True))
    assert out_bf16.shape == (batch, 1)
    assert jnp.allclose(out_bf16, ref, atol=3e-2, rtol=3e-2), "bf16 kernel mismatch"

    print("KERNEL_OK")
</pallas_src>

<mosaic_0001>
module attributes {stable_mosaic.version = 11 : i64} {
  func.func @_critic_kernel(%arg0: i32, %arg1: memref<16x36xf32, #tpu.memory_space<vmem>>, %arg2: memref<36x256xf32, #tpu.memory_space<vmem>>, %arg3: memref<1x256xf32, #tpu.memory_space<vmem>>, %arg4: memref<256x256xf32, #tpu.memory_space<vmem>>, %arg5: memref<1x256xf32, #tpu.memory_space<vmem>>, %arg6: memref<256x128xf32, #tpu.memory_space<vmem>>, %arg7: memref<1x128xf32, #tpu.memory_space<vmem>>, %arg8: memref<1x128xf32, #tpu.memory_space<vmem>>, %arg9: memref<1x1xf32, #tpu.memory_space<vmem>>, %arg10: memref<16x1xf32, #tpu.memory_space<vmem>>) attributes {dimension_semantics = [#tpu.dimension_semantics<parallel>], iteration_bounds = array<i64: 1>, scalar_prefetch = 0 : i64, scratch_operands = 0 : i64, tpu.core_type = #tpu.core_type<tc>, window_params = [{transform_indices = @transform_0, window_bounds = array<i64: 16, 36>}, {pipeline_mode = #tpu.pipeline_mode<synchronous>, transform_indices = @transform_1, window_bounds = array<i64: 36, 256>}, {pipeline_mode = #tpu.pipeline_mode<synchronous>, transform_indices = @transform_2, window_bounds = array<i64: 1, 256>}, {pipeline_mode = #tpu.pipeline_mode<synchronous>, transform_indices = @transform_3, window_bounds = array<i64: 256, 256>}, {pipeline_mode = #tpu.pipeline_mode<synchronous>, transform_indices = @transform_4, window_bounds = array<i64: 1, 256>}, {pipeline_mode = #tpu.pipeline_mode<synchronous>, transform_indices = @transform_5, window_bounds = array<i64: 256, 128>}, {pipeline_mode = #tpu.pipeline_mode<synchronous>, transform_indices = @transform_6, window_bounds = array<i64: 1, 128>}, {pipeline_mode = #tpu.pipeline_mode<synchronous>, transform_indices = @transform_7, window_bounds = array<i64: 1, 128>}, {pipeline_mode = #tpu.pipeline_mode<synchronous>, transform_indices = @transform_8, window_bounds = array<i64: 1, 1>}, {transform_indices = @transform_9, window_bounds = array<i64: 16, 1>}]} {
    %c0 = arith.constant 0 : index
    %c0_0 = arith.constant 0 : index
    %0 = vector.load %arg1[%c0, %c0_0] : memref<16x36xf32, #tpu.memory_space<vmem>>, vector<16x36xf32>
    %c0_1 = arith.constant 0 : index
    %c0_2 = arith.constant 0 : index
    %1 = vector.load %arg2[%c0_1, %c0_2] : memref<36x256xf32, #tpu.memory_space<vmem>>, vector<36x256xf32>
    %cst = arith.constant dense<0.000000e+00> : vector<16x256xf32>
    %2 = tpu.matmul %0, %1, %cst {dimension_numbers = #tpu.dot_dimension_numbers<[1], [0], [0], [1], [0, 0, 1, 1], [], []>} : vector<16x36xf32>, vector<36x256xf32>, vector<16x256xf32> -> vector<16x256xf32>
    %c0_3 = arith.constant 0 : index
    %c0_4 = arith.constant 0 : index
    %3 = vector.load %arg3[%c0_3, %c0_4] : memref<1x256xf32, #tpu.memory_space<vmem>>, vector<1x256xf32>
    %4 = vector.broadcast %3 : vector<1x256xf32> to vector<16x256xf32>
    %5 = arith.addf %2, %4 : vector<16x256xf32>
    %6 = math.tanh %5 : vector<16x256xf32>
    %c0_5 = arith.constant 0 : index
    %c0_6 = arith.constant 0 : index
    %7 = vector.load %arg4[%c0_5, %c0_6] : memref<256x256xf32, #tpu.memory_space<vmem>>, vector<256x256xf32>
    %cst_7 = arith.constant dense<0.000000e+00> : vector<16x256xf32>
    %8 = tpu.matmul %6, %7, %cst_7 {dimension_numbers = #tpu.dot_dimension_numbers<[1], [0], [0], [1], [0, 0, 1, 1], [], []>} : vector<16x256xf32>, vector<256x256xf32>, vector<16x256xf32> -> vector<16x256xf32>
    %c0_8 = arith.constant 0 : index
    %c0_9 = arith.constant 0 : index
    %9 = vector.load %arg5[%c0_8, %c0_9] : memref<1x256xf32, #tpu.memory_space<vmem>>, vector<1x256xf32>
    %10 = vector.broadcast %9 : vector<1x256xf32> to vector<16x256xf32>
    %11 = arith.addf %8, %10 : vector<16x256xf32>
    %cst_10 = arith.constant 2.000000e-01 : f32
    %12 = vector.broadcast %cst_10 : f32 to vector<16x256xf32>
    %13 = arith.mulf %12, %11 : vector<16x256xf32>
    %14 = arith.maximumf %11, %13 : vector<16x256xf32>
    %c0_11 = arith.constant 0 : index
    %c0_12 = arith.constant 0 : index
    %15 = vector.load %arg6[%c0_11, %c0_12] : memref<256x128xf32, #tpu.memory_space<vmem>>, vector<256x128xf32>
    %cst_13 = arith.constant dense<0.000000e+00> : vector<16x128xf32>
    %16 = tpu.matmul %14, %15, %cst_13 {dimension_numbers = #tpu.dot_dimension_numbers<[1], [0], [0], [1], [0, 0, 1, 1], [], []>} : vector<16x256xf32>, vector<256x128xf32>, vector<16x128xf32> -> vector<16x128xf32>
    %c0_14 = arith.constant 0 : index
    %c0_15 = arith.constant 0 : index
    %17 = vector.load %arg7[%c0_14, %c0_15] : memref<1x128xf32, #tpu.memory_space<vmem>>, vector<1x128xf32>
    %18 = vector.broadcast %17 : vector<1x128xf32> to vector<16x128xf32>
    %19 = arith.addf %16, %18 : vector<16x128xf32>
    %20 = math.tanh %19 : vector<16x128xf32>
    %c0_16 = arith.constant 0 : index
    %c0_17 = arith.constant 0 : index
    %21 = vector.load %arg8[%c0_16, %c0_17] : memref<1x128xf32, #tpu.memory_space<vmem>>, vector<1x128xf32>
    %22 = vector.broadcast %21 : vector<1x128xf32> to vector<16x128xf32>
    %23 = arith.mulf %20, %22 : vector<16x128xf32>
    %cst_18 = arith.constant dense<0.000000e+00> : vector<16xf32>
    %24 = vector.multi_reduction <add>, %23, %cst_18 [1] : vector<16x128xf32> to vector<16xf32>
    %25 = vector.shape_cast %24 : vector<16xf32> to vector<16x1xf32>
    %c0_19 = arith.constant 0 : index
    %c0_20 = arith.constant 0 : index
    %26 = vector.load %arg9[%c0_19, %c0_20] : memref<1x1xf32, #tpu.memory_space<vmem>>, vector<1x1xf32>
    %27 = vector.broadcast %26 : vector<1x1xf32> to vector<16x1xf32>
    %28 = arith.addf %25, %27 : vector<16x1xf32>
    %c0_21 = arith.constant 0 : index
    %c0_22 = arith.constant 0 : index
    %29 = vector.load %arg10[%c0_21, %c0_22] : memref<16x1xf32, #tpu.memory_space<vmem>>, vector<16x1xf32>
    tpu.vector_store %arg10[%c0_21, %c0_22], %28 {strides = array<i32>} : memref<16x1xf32, #tpu.memory_space<vmem>>, vector<16x1xf32>,
    return
  }
  func.func @transform_0(%arg0: i32) -> (i32, i32) {
    %c0_i32 = arith.constant 0 : i32
    %c0_i32_0 = arith.constant 0 : i32
    return %arg0, %c0_i32 : i32, i32
  }
  func.func @transform_1(%arg0: i32) -> (i32, i32) {
    %c0_i32 = arith.constant 0 : i32
    %c0_i32_0 = arith.constant 0 : i32
    %c0_i32_1 = arith.constant 0 : i32
    return %c0_i32, %c0_i32_0 : i32, i32
  }
  func.func @transform_2(%arg0: i32) -> (i32, i32) {
    %c0_i32 = arith.constant 0 : i32
    %c0_i32_0 = arith.constant 0 : i32
    %c0_i32_1 = arith.constant 0 : i32
    return %c0_i32, %c0_i32_0 : i32, i32
  }
  func.func @transform_3(%arg0: i32) -> (i32, i32) {
    %c0_i32 = arith.constant 0 : i32
    %c0_i32_0 = arith.constant 0 : i32
    %c0_i32_1 = arith.constant 0 : i32
    return %c0_i32, %c0_i32_0 : i32, i32
  }
  func.func @transform_4(%arg0: i32) -> (i32, i32) {
    %c0_i32 = arith.constant 0 : i32
    %c0_i32_0 = arith.constant 0 : i32
    %c0_i32_1 = arith.constant 0 : i32
    return %c0_i32, %c0_i32_0 : i32, i32
  }
  func.func @transform_5(%arg0: i32) -> (i32, i32) {
    %c0_i32 = arith.constant 0 : i32
    %c0_i32_0 = arith.constant 0 : i32
    %c0_i32_1 = arith.constant 0 : i32
    return %c0_i32, %c0_i32_0 : i32, i32
  }
  func.func @transform_6(%arg0: i32) -> (i32, i32) {
    %c0_i32 = arith.constant 0 : i32
    %c0_i32_0 = arith.constant 0 : i32
    %c0_i32_1 = arith.constant 0 : i32
    return %c0_i32, %c0_i32_0 : i32, i32
  }
  func.func @transform_7(%arg0: i32) -> (i32, i32) {
    %c0_i32 = arith.constant 0 : i32
    %c0_i32_0 = arith.constant 0 : i32
    %c0_i32_1 = arith.constant 0 : i32
    return %c0_i32, %c0_i32_0 : i32, i32
  }
  func.func @transform_8(%arg0: i32) -> (i32, i32) {
    %c0_i32 = arith.constant 0 : i32
    %c0_i32_0 = arith.constant 0 : i32
    %c0_i32_1 = arith.constant 0 : i32
    return %c0_i32, %c0_i32_0 : i32, i32
  }
  func.func @transform_9(%arg0: i32) -> (i32, i32) {
    %c0_i32 = arith.constant 0 : i32
    %c0_i32_0 = arith.constant 0 : i32
    return %arg0, %c0_i32 : i32, i32
  }
}

</mosaic_0001>

<bundles_post_ra>
// kernel: tpu_custom_call.1
= control target key start
LH: loop header
LB: loop body
LE: loop exit
PB: predicated region body
PF: predicated region fallthrough
CT: control target
= control target key end

     0   :  { %s932_s0 = inlined_call_operand.hbm [shape: f32[16,36], index: 0, kind: input, shape index: {}]   ;;  %s933_s1 = inlined_call_operand.hbm [shape: f32[36,256], index: 1, kind: input, shape index: {}]   ;;  %s934_s2 = inlined_call_operand.vmem [shape: f32[1,256], index: 2, kind: input, shape index: {}]   ;;  %s935_s3 = inlined_call_operand.hbm [shape: f32[256,256], index: 3, kind: input, shape index: {}]   ;;  %s936_s4 = inlined_call_operand.vmem [shape: f32[1,256], index: 4, kind: input, shape index: {}]   ;;  %s937_s5 = inlined_call_operand.hbm [shape: f32[256,128], index: 5, kind: input, shape index: {}]   ;;  %s938_s6 = inlined_call_operand.vmem [shape: f32[1,128], index: 6, kind: input, shape index: {}]   ;;  %s939_s7 = inlined_call_operand.vmem [shape: f32[1,128], index: 7, kind: input, shape index: {}]   ;;  %s940_s8 = inlined_call_operand.<no memory space> [shape: f32[1,1], index: 8, kind: input, shape index: {}]   ;;  %s941_s9 = inlined_call_operand.vmem [shape: f32[16,1], index: 9, kind: output, shape index: {}]  }
   0x1   :  { %v14_v0 = vstv %s940_s8 }
   0x2   :  { %15 = vst [vmem:[#allocation2] sm:$0x1] %v14_v0 }
   0x3   :  { %16 = vsyncpa [#allocation4], 0 }
   0x4   :  { %17 = vsyncpa [#allocation6], 0 }
   0x5   :  { %18 = vsyncpa [#allocation9], 0  ;;  %s781_s11 = smov [#allocation5]   ;;  %s687_s15 = scalar_lea.hbm %s933_s1, 1280 }
   0x6   :  { %s36_s12 = sshll.u32 %s781_s11, 4  ;;  %p688_p0 = scmp.ne.s32.totalorder %s933_s1, %s687_s15  ;;  %s37_s12 = int_to_ptr.vmem [resolvable:$true] %s36_s12 }
   0x7   :  { %p691_p1 = scmp.lt.u32.totalorder %s687_s15, %s933_s1 }
   0x9   :  { %p693_p2 = pnand %p691_p1, %p688_p0 }
   0xb   :  { %696 = shalt.err (!%p693_p2)
}
   0xc   :  { %s697_s8 = scalar_lea.vmem %s37_s12, 1280  ;;  %p702_p4 = scmp.lt.s32.totalorder %s37_s12, %s37_s12 }
   0xd   :  { %p698_p3 = scmp.ne.s32.totalorder %s37_s12, %s697_s8  ;;  %p703_p5 = scmp.lt.s32.totalorder %s697_s8, %s697_s8 }
   0xf   :  { %p704_p6 = por %p703_p5, %p702_p4 }
  0x11   :  { %p705_p7 = pnand %p704_p6, %p698_p3 }
  0x13   :  { %708 = shalt.err (!%p705_p7)
}
  0x14   :  { %s782_s20 = smov 256   ;;  %s783_s21 = smov 16  }
  0x15   :  { %42 = dma.hbm_to_vmem [thread:$0]  %s933_s1, 1280, %s37_s12, [#allocation6], %s782_s20, %s782_s20, %s783_s21  }
  0x16   :  { %s784_s24 = smov [#allocation3]   ;;  %s709_s28 = scalar_lea.hbm %s932_s0, 256 }
  0x17   :  { %s24_s25 = sshll.u32 %s784_s24, 4  ;;  %p710_p8 = scmp.ne.s32.totalorder %s932_s0, %s709_s28  ;;  %s25_s25 = int_to_ptr.vmem [resolvable:$true] %s24_s25 }
  0x18   :  { %p713_p9 = scmp.lt.u32.totalorder %s709_s28, %s932_s0 }
  0x1a   :  { %p715_p10 = pnand %p713_p9, %p710_p8 }
  0x1c   :  { %718 = shalt.err (!%p715_p10)
}
  0x1d   :  { %s719_s13 = scalar_lea.vmem %s25_s25, 256  ;;  %p724_p12 = scmp.lt.s32.totalorder %s25_s25, %s25_s25 }
  0x1e   :  { %p720_p11 = scmp.ne.s32.totalorder %s25_s25, %s719_s13  ;;  %p725_p13 = scmp.lt.s32.totalorder %s719_s13, %s719_s13 }
  0x20   :  { %p726_p0 = por %p725_p13, %p724_p12 }
  0x22   :  { %p727_p1 = pnand %p726_p0, %p720_p11 }
  0x24   :  { %730 = shalt.err (!%p727_p1)
}
  0x25   :  { %s785_s1 = smov 128   ;;  %s786_s12 = smov 8  }
  0x26   :  { %30 = dma.hbm_to_vmem [thread:$0]  %s932_s0, 256, %s25_s25, [#allocation4], %s785_s1, %s785_s1, %s786_s12  }
  0x27   :  { %s787_s16 = smov [#allocation7]   ;;  %s788_s18 = smov [#allocation8]  }
  0x28   :  { %s50_s17 = sshll.u32 %s787_s16, 4  ;;  %s64_s19 = sshll.u32 %s788_s18, 4  ;;  %s51_s17 = int_to_ptr.vmem [resolvable:$true] %s50_s17  ;;  %s873_s19 = int_to_ptr.vmem [resolvable:$true] %s64_s19 }
  0x29   :  { %s731_s23 = scalar_lea.hbm %s935_s3, 8192 }
  0x2a   :  { %p732_p2 = scmp.ne.s32.totalorder %s935_s3, %s731_s23  ;;  %p735_p3 = scmp.lt.u32.totalorder %s731_s23, %s935_s3 }
  0x2c   :  { %p737_p4 = pnand %p735_p3, %p732_p2 }
  0x2e   :  { %740 = shalt.err (!%p737_p4)
}
  0x2f   :  { %s741_s0 = scalar_lea.vmem %s51_s17, 8192  ;;  %p746_p6 = scmp.lt.s32.totalorder %s51_s17, %s51_s17 }
  0x30   :  { %p742_p5 = scmp.ne.s32.totalorder %s51_s17, %s741_s0  ;;  %p747_p7 = scmp.lt.s32.totalorder %s741_s0, %s741_s0 }
  0x32   :  { %p748_p8 = por %p747_p7, %p746_p6 }
  0x34   :  { %p749_p9 = pnand %p748_p8, %p742_p5 }
  0x36   :  { %752 = shalt.err (!%p749_p9)
}
  0x37   :  { %56 = dma.hbm_to_vmem [thread:$0]  %s935_s3, 8192, %s51_s17, [#allocation6], %s782_s20, %s782_s20, %s783_s21  }
  0x38   :  { %s753_s11 = scalar_lea.hbm %s937_s5, 4096 }
  0x39   :  { %p754_p10 = scmp.ne.s32.totalorder %s937_s5, %s753_s11  ;;  %p757_p11 = scmp.lt.u32.totalorder %s753_s11, %s937_s5 }
  0x3b   :  { %p759_p12 = pnand %p757_p11, %p754_p10 }
  0x3d   :  { %762 = shalt.err (!%p759_p12)
}
  0x3e   :  { %s763_s18 = scalar_lea.vmem %s873_s19, 4096  ;;  %p768_p0 = scmp.lt.s32.totalorder %s873_s19, %s873_s19 }
  0x3f   :  { %p764_p13 = scmp.ne.s32.totalorder %s873_s19, %s763_s18  ;;  %p769_p1 = scmp.lt.s32.totalorder %s763_s18, %s763_s18 }
  0x41   :  { %p770_p2 = por %p769_p1, %p768_p0 }
  0x43   :  { %p771_p3 = pnand %p770_p2, %p764_p13 }
  0x45   :  { %774 = shalt.err (!%p771_p3)
}
  0x46   :  { %70 = dma.hbm_to_vmem [thread:$0]  %s937_s5, 4096, %s873_s19, [#allocation9], %s785_s1, %s785_s1, %s786_s12  }
  0x47   :  { %775 = dma.done.wait [#allocation4], 256  }
  0x48   :  { %776 = vsyncadd [#allocation4], 4294967040 }
  0x49   :  { %777 = dma.done.wait [#allocation6], 9472  }
  0x4a   :  { %778 = vsyncadd [#allocation6], 4294957824 }
  0x4b   :  { %779 = dma.done.wait [#allocation9], 4096  }
  0x4c   :  { %780 = vsyncadd [#allocation9], 4294963200  ;;  %v789_v1 = vmov 0.0   ;;  %v92_v2 = vld [vmem:[#allocation5 + $0x8] sm:$0xff]  ;;  %v94_v3 = vld [vmem:[#allocation5 + $0x18] sm:$0xff]  ;;  %vm120_vm0 = vcmask 1043456  }
  0x4d   :  { %191 = vmatprep.mubr.f32.mxu0 %v789_v1  ;;  %v91_v4 = vld [vmem:[#allocation5] sm:$0xff]  ;;  %v562_v5 = vpack.c.bf16 %v94_v3, %v92_v2  ;;  %v93_v6 = vld [vmem:[#allocation5 + $0x10] sm:$0xff]  ;;  %v96_v7 = vld [vmem:[#allocation5 + $0x28] sm:$0xff]  ;;  %vm113_vm1 = vcmask 293888   ;;  %vm507_vm2 = vcmask 7168  }
  0x4e   :  { %v98_v8 = vld [vmem:[#allocation5 + $0x38] sm:$0xff]  ;;  %v564_v9 = vpack.c.bf16 %v93_v6, %v91_v4  ;;  %v95_v11 = vld [vmem:[#allocation5 + $0x20] sm:$0xff]  ;;  %v97_v12 = vld [vmem:[#allocation5 + $0x30] sm:$0xff] }
  0x4f   :  { %v566_v10 = vpack.c.bf16 %v98_v8, %v96_v7  ;;  %563 = vmatprep.subr.bf16.mxu0 %v562_v5  ;;  %v568_v13 = vpack.c.bf16 %v97_v12, %v95_v11  ;;  %v100_v14 = vld [vmem:[#allocation5 + $0x48] sm:$0xf]  ;;  %v209_v15 = vld [vmem:[#allocation7 + $0x8] sm:$0xff]  ;;  %v208_v17 = vld [vmem:[#allocation7] sm:$0xff] }
  0x50   :  { %565 = vmatpush1.bf16.msra.mxu0 %v564_v9  ;;  %v211_v16 = vld [vmem:[#allocation7 + $0x18] sm:$0xff]  ;;  %v210_v19 = vld [vmem:[#allocation7 + $0x10] sm:$0xff]  ;;  %v213_v20 = vld [vmem:[#allocation7 + $0x28] sm:$0xff] }
  0x51   :  { %567 = vmatprep.subr.bf16.mxu0 %v566_v10  ;;  %v570_v18 = vpack.c.bf16 %v211_v16, %v209_v15  ;;  %v215_v21 = vld [vmem:[#allocation7 + $0x38] sm:$0xff]  ;;  %v572_v22 = vpack.c.bf16 %v210_v19, %v208_v17  ;;  %v212_v24 = vld [vmem:[#allocation7 + $0x20] sm:$0xff]  ;;  %v214_v25 = vld [vmem:[#allocation7 + $0x30] sm:$0xff] }
  0x52   :  { %v574_v23 = vpack.c.bf16 %v215_v21, %v213_v20  ;;  %v217_v26 = vld [vmem:[#allocation7 + $0x48] sm:$0xff]  ;;  %v219_v27 = vld [vmem:[#allocation7 + $0x58] sm:$0xff]  ;;  %v576_v28 = vpack.c.bf16 %v214_v25, %v212_v24  ;;  %v99_v29 = vld [vmem:[#allocation5 + $0x40] sm:$0xf] }
  0x53   :  { %571 = vmatprep.subr.bf16.mxu1 %v570_v18  ;;  %v578_v30 = vpack.c.bf16 %v219_v27, %v217_v26  ;;  %v216_v31 = vld [vmem:[#allocation7 + $0x40] sm:$0xff]  ;;  %v218_v32 = vld [vmem:[#allocation7 + $0x50] sm:$0xff]  ;;  %v221_v34 = vld [vmem:[#allocation7 + $0x68] sm:$0xff] }
  0x54   :  { %569 = vmatpush1.bf16.msra.mxu0 %v568_v13  ;;  %573 = vmatpush1.bf16.msra.mxu1 %v572_v22  ;;  %v89_v33 = vld [vmem:[#allocation3] sm:$0xff]  ;;  %v223_v35 = vld [vmem:[#allocation7 + $0x78] sm:$0xff]  ;;  %v580_v36 = vpack.c.bf16 %v218_v32, %v216_v31  ;;  %v222_v39 = vld [vmem:[#allocation7 + $0x70] sm:$0xff] }
  0x55   :  { %517 = vmatprep.subr.msk.mxu0 %vm120_vm0, %v100_v14  ;;  %575 = vmatprep.subr.bf16.mxu1 %v574_v23  ;;  %v582_v37 = vpack.c.bf16 %v223_v35, %v221_v34  ;;  %v220_v38 = vld [vmem:[#allocation7 + $0x60] sm:$0xff]  ;;  %v90_v40 = vld [vmem:[#allocation3 + $0x8] sm:$0xff]  ;;  %v227_v42 = vld [vmem:[#allocation7 + $0x98] sm:$0xff] }
  0x56   :  { %v225_v41 = vld [vmem:[#allocation7 + $0x88] sm:$0xff]  ;;  %v584_v43 = vpack.c.bf16 %v222_v39, %v220_v38  ;;  %v224_v45 = vld [vmem:[#allocation7 + $0x80] sm:$0xff]  ;;  %v226_v46 = vld [vmem:[#allocation7 + $0x90] sm:$0xff] }
  0x57   :  { %v586_v44 = vpack.c.bf16 %v227_v42, %v225_v41  ;;  %v229_v47 = vld [vmem:[#allocation7 + $0xa8] sm:$0xff]  ;;  %v231_v48 = vld [vmem:[#allocation7 + $0xb8] sm:$0xff]  ;;  %v588_v49 = vpack.c.bf16 %v226_v46, %v224_v45  ;;  %v228_v51 = vld [vmem:[#allocation7 + $0xa0] sm:$0xff] }
  0x58   :  { %518 = vmatpush1.msk.msra.mxu0 %vm120_vm0, %v99_v29  ;;  %577 = vmatpush1.bf16.msra.mxu1 %v576_v28  ;;  %v590_v50 = vpack.c.bf16 %v231_v48, %v229_v47  ;;  %v230_v52 = vld [vmem:[#allocation7 + $0xb0] sm:$0xff]  ;;  %v233_v53 = vld [vmem:[#allocation7 + $0xc8] sm:$0xff]  ;;  %v235_v54 = vld [vmem:[#allocation7 + $0xd8] sm:$0xff] }
  0x59   :  { %519 = vmatmul.mubr.msk.f32.vlgmr.msra.gmra.mrb[0].mxu0 %vm113_vm1, %v89_v33  ;;  %579 = vmatprep.subr.bf16.mxu1 %v578_v30  ;;  %v592_v55 = vpack.c.bf16 %v230_v52, %v228_v51  ;;  %v594_v56 = vpack.c.bf16 %v235_v54, %v233_v53  ;;  %v232_v57 = vld [vmem:[#allocation7 + $0xc0] sm:$0xff]  ;;  %v234_v58 = vld [vmem:[#allocation7 + $0xd0] sm:$0xff]  ;;  %v237_v59 = vld [vmem:[#allocation7 + $0xe8] sm:$0xff] }
  0x5a   :  { %197 = vmatprep.mubr.f32.mxu0 %v789_v1  ;;  %v239_v60 = vld [vmem:[#allocation7 + $0xf8] sm:$0xff]  ;;  %v596_v61 = vpack.c.bf16 %v234_v58, %v232_v57  ;;  %v236_v63 = vld [vmem:[#allocation7 + $0xe0] sm:$0xff]  ;;  %v238_v0 = vld [vmem:[#allocation7 + $0xf0] sm:$0xff] }
  0x5b   :  { %v598_v62 = vpack.c.bf16 %v239_v60, %v237_v59  ;;  %v241_v1 = vld [vmem:[#allocation7 + $0x108] sm:$0xff]  ;;  %v243_v2 = vld [vmem:[#allocation7 + $0x118] sm:$0xff]  ;;  %v600_v3 = vpack.c.bf16 %v238_v0, %v236_v63  ;;  %v240_v5 = vld [vmem:[#allocation7 + $0x100] sm:$0xff] }
  0x5c   :  { %581 = vmatpush1.bf16.msra.mxu1 %v580_v36  ;;  %v602_v4 = vpack.c.bf16 %v243_v2, %v241_v1  ;;  %v242_v6 = vld [vmem:[#allocation7 + $0x110] sm:$0xff]  ;;  %v245_v7 = vld [vmem:[#allocation7 + $0x128] sm:$0xff]  ;;  %v247_v8 = vld [vmem:[#allocation7 + $0x138] sm:$0xff] }
  0x5d   :  { %520 = vmatmul.mubr.msk.f32.gmra.mrb[2].mxu0 %vm113_vm1, %v90_v40  ;;  %583 = vmatprep.subr.bf16.mxu1 %v582_v37  ;;  %v604_v9 = vpack.c.bf16 %v242_v6, %v240_v5  ;;  %v606_v10 = vpack.c.bf16 %v247_v8, %v245_v7  ;;  %v244_v11 = vld [vmem:[#allocation7 + $0x120] sm:$0xff]  ;;  %v246_v12 = vld [vmem:[#allocation7 + $0x130] sm:$0xff]  ;;  %v249_v13 = vld [vmem:[#allocation7 + $0x148] sm:$0xff] }
  0x5e   :  { %v251_v14 = vld [vmem:[#allocation7 + $0x158] sm:$0xff]  ;;  %v608_v15 = vpack.c.bf16 %v246_v12, %v244_v11  ;;  %v248_v17 = vld [vmem:[#allocation7 + $0x140] sm:$0xff]  ;;  %v250_v18 = vld [vmem:[#allocation7 + $0x150] sm:$0xff] }
  0x5f   :  { %v610_v16 = vpack.c.bf16 %v251_v14, %v249_v13  ;;  %v253_v19 = vld [vmem:[#allocation7 + $0x168] sm:$0xff]  ;;  %v255_v20 = vld [vmem:[#allocation7 + $0x178] sm:$0xff]  ;;  %v612_v21 = vpack.c.bf16 %v250_v18, %v248_v17  ;;  %v252_v23 = vld [vmem:[#allocation7 + $0x160] sm:$0xff] }
  0x60   :  { %585 = vmatpush1.bf16.msra.mxu1 %v584_v43  ;;  %v614_v22 = vpack.c.bf16 %v255_v20, %v253_v19  ;;  %v254_v24 = vld [vmem:[#allocation7 + $0x170] sm:$0xff]  ;;  %v257_v26 = vld [vmem:[#allocation7 + $0x188] sm:$0xff]  ;;  %v259_v27 = vld [vmem:[#allocation7 + $0x198] sm:$0xff] }
  0x61   :  { %587 = vmatprep.subr.bf16.mxu1 %v586_v44  ;;  %v616_v25 = vpack.c.bf16 %v254_v24, %v252_v23  ;;  %v618_v28 = vpack.c.bf16 %v259_v27, %v257_v26  ;;  %v256_v29 = vld [vmem:[#allocation7 + $0x180] sm:$0xff]  ;;  %v258_v30 = vld [vmem:[#allocation7 + $0x190] sm:$0xff]  ;;  %v261_v32 = vld [vmem:[#allocation7 + $0x1a8] sm:$0xff] }
  0x62   :  { %v620_v31 = vpack.c.bf16 %v258_v30, %v256_v29  ;;  %v263_v33 = vld [vmem:[#allocation7 + $0x1b8] sm:$0xff]  ;;  %v260_v35 = vld [vmem:[#allocation7 + $0x1a0] sm:$0xff]  ;;  %v262_v36 = vld [vmem:[#allocation7 + $0x1b0] sm:$0xff] }
  0x63   :  { %v622_v34 = vpack.c.bf16 %v263_v33, %v261_v32  ;;  %v624_v37 = vpack.c.bf16 %v262_v36, %v260_v35  ;;  %v265_v38 = vld [vmem:[#allocation7 + $0x1c8] sm:$0xff]  ;;  %v267_v39 = vld [vmem:[#allocation7 + $0x1d8] sm:$0xff]  ;;  %v264_v41 = vld [vmem:[#allocation7 + $0x1c0] sm:$0xff] }
  0x64   :  { %589 = vmatpush1.bf16.msra.mxu1 %v588_v49  ;;  %v626_v40 = vpack.c.bf16 %v267_v39, %v265_v38  ;;  %v266_v42 = vld [vmem:[#allocation7 + $0x1d0] sm:$0xff]  ;;  %v269_v44 = vld [vmem:[#allocation7 + $0x1e8] sm:$0xff]  ;;  %v271_v45 = vld [vmem:[#allocation7 + $0x1f8] sm:$0xff] }
  0x65   :  { %591 = vmatprep.subr.bf16.mxu1 %v590_v50  ;;  %v628_v43 = vpack.c.bf16 %v266_v42, %v264_v41  ;;  %v268_v46 = vld [vmem:[#allocation7 + $0x1e0] sm:$0xff]  ;;  %v630_v47 = vpack.c.bf16 %v271_v45, %v269_v44  ;;  %v270_v48 = vld [vmem:[#allocation7 + $0x1f0] sm:$0xff]  ;;  %v386_v51 = vld [vmem:[#allocation8 + $0x88] sm:$0xff] }
  0x66   :  { %v632_v49 = vpack.c.bf16 %v270_v48, %v268_v46  ;;  %v385_v50 = vld [vmem:[#allocation8 + $0x80] sm:$0xff]  ;;  %v370_v54 = vld [vmem:[#allocation8 + $0x8] sm:$0xff]  ;;  %v371_v59 = vld [vmem:[#allocation8 + $0x10] sm:$0xff] }
  0x67   :  { %v369_v52 = vld [vmem:[#allocation8] sm:$0xff]  ;;  %v634_v53 = vpack.c.bf16 %v386_v51, %v385_v50  ;;  %v372_v60 = vld [vmem:[#allocation8 + $0x18] sm:$0xff]  ;;  %v374_v2 = vld [vmem:[#allocation8 + $0x28] sm:$0xff] }
  0x68   :  { %593 = vmatpush1.bf16.msra.mxu1 %v592_v55  ;;  %v387_v55 = vld [vmem:[#allocation8 + $0x90] sm:$0xff]  ;;  %v636_v57 = vpack.c.bf16 %v370_v54, %v369_v52  ;;  %v640_v63 = vpack.c.bf16 %v372_v60, %v371_v59  ;;  %v373_v1 = vld [vmem:[#allocation8 + $0x20] sm:$0xff]  ;;  %v376_v8 = vld [vmem:[#allocation8 + $0x38] sm:$0xff] }
  0x69   :  { %595 = vmatprep.subr.bf16.mxu1 %v594_v56  ;;  %v388_v56 = vld [vmem:[#allocation8 + $0x98] sm:$0xff]  ;;  %635 = vmatprep.subr.bf16.mxu0 %v634_v53  ;;  %v644_v5 = vpack.c.bf16 %v374_v2, %v373_v1  ;;  %v375_v7 = vld [vmem:[#allocation8 + $0x30] sm:$0xff]  ;;  %v377_v13 = vld [vmem:[#allocation8 + $0x40] sm:$0xff] }
  0x6a   :  { %v638_v58 = vpack.c.bf16 %v388_v56, %v387_v55  ;;  %637 = vmatpush3.bf16.msra.mxu0 %v636_v57  ;;  %v648_v11 = vpack.c.bf16 %v376_v8, %v375_v7  ;;  %v378_v14 = vld [vmem:[#allocation8 + $0x48] sm:$0xff]  ;;  %v379_v19 = vld [vmem:[#allocation8 + $0x50] sm:$0xff]  ;;  %v380_v20 = vld [vmem:[#allocation8 + $0x58] sm:$0xff] }
  0x6b   :  { %v652_v17 = vpack.c.bf16 %v378_v14, %v377_v13  ;;  %v397_v41 = vld [vmem:[#allocation8 + $0xe0] sm:$0xff]  ;;  %v398_v42 = vld [vmem:[#allocation8 + $0xe8] sm:$0xff]  ;;  %v400_v48 = vld [vmem:[#allocation8 + $0xf8] sm:$0xff] }
  0x6c   :  { %597 = vmatpush1.bf16.msra.mxu1 %v596_v61  ;;  %v389_v61 = vld [vmem:[#allocation8 + $0xa0] sm:$0xff]  ;;  %639 = vmatprep.subr.bf16.mxu0 %v638_v58  ;;  %v382_v45 = vld [vmem:[#allocation8 + $0x68] sm:$0xff]  ;;  %v383_v50 = vld [vmem:[#allocation8 + $0x70] sm:$0xff] }
  0x6d   :  { %599 = vmatprep.subr.bf16.mxu1 %v598_v62  ;;  %v390_v62 = vld [vmem:[#allocation8 + $0xa8] sm:$0xff]  ;;  %v381_v44 = vld [vmem:[#allocation8 + $0x60] sm:$0xff]  ;;  %v384_v51 = vld [vmem:[#allocation8 + $0x78] sm:$0xff] }
  0x6e   :  { %v642_v0 = vpack.c.bf16 %v390_v62, %v389_v61  ;;  %641 = vmatpush3.bf16.msra.mxu0 %v640_v63  ;;  %v660_v46 = vpack.c.bf16 %v382_v45, %v381_v44  ;;  %v664_v52 = vpack.c.bf16 %v384_v51, %v383_v50  ;;  %v272_v53 = vld [vmem:[%s936_s4] sm:$0x3] }
  0x70   :  { %601 = vmatpush1.bf16.msra.mxu1 %v600_v3  ;;  %v391_v3 = vld [vmem:[#allocation8 + $0xb0] sm:$0xff]  ;;  %643 = vmatprep.subr.bf16.mxu0 %v642_v0 }
  0x71   :  { %603 = vmatprep.subr.bf16.mxu1 %v602_v4  ;;  %v392_v4 = vld [vmem:[#allocation8 + $0xb8] sm:$0xff] }
  0x72   :  { %v646_v6 = vpack.c.bf16 %v392_v4, %v391_v3  ;;  %645 = vmatpush3.bf16.msra.mxu0 %v644_v5 }
  0x74   :  { %605 = vmatpush1.bf16.msra.mxu1 %v604_v9  ;;  %v393_v9 = vld [vmem:[#allocation8 + $0xc0] sm:$0xff]  ;;  %647 = vmatprep.subr.bf16.mxu0 %v646_v6 }
  0x75   :  { %607 = vmatprep.subr.bf16.mxu1 %v606_v10  ;;  %v394_v10 = vld [vmem:[#allocation8 + $0xc8] sm:$0xff] }
  0x76   :  { %v650_v12 = vpack.c.bf16 %v394_v10, %v393_v9  ;;  %649 = vmatpush3.bf16.msra.mxu0 %v648_v11  ;;  %v521_v9 = vld [vmem:[%s938_s6] ss:$0 sm:$0xff] }
  0x78   :  { %609 = vmatpush1.bf16.msra.mxu1 %v608_v15  ;;  %v395_v15 = vld [vmem:[#allocation8 + $0xd0] sm:$0xff]  ;;  %651 = vmatprep.subr.bf16.mxu0 %v650_v12 }
  0x79   :  { %611 = vmatprep.subr.bf16.mxu1 %v610_v16  ;;  %v396_v16 = vld [vmem:[#allocation8 + $0xd8] sm:$0xff] }
  0x7a   :  { %v654_v18 = vpack.c.bf16 %v396_v16, %v395_v15  ;;  %653 = vmatpush3.bf16.msra.mxu0 %v652_v17  ;;  %v522_v17 = vld [vmem:[%s939_s7] ss:$0 sm:$0xff] }
  0x7c   :  { %613 = vmatpush1.bf16.msra.mxu1 %v612_v21  ;;  %v656_v21 = vpack.c.bf16 %v380_v20, %v379_v19  ;;  %655 = vmatprep.subr.bf16.mxu0 %v654_v18 }
  0x7d   :  { %615 = vmatprep.subr.bf16.mxu1 %v614_v22  ;;  %v103_v22 = vlaneseq }
  0x7e   :  { %657 = vmatpush3.bf16.msra.mxu0 %v656_v21 }
  0x7f   :  { %v104_v23 = vshrl.u32 %v103_v22, 7  ;;  %v523_v22 = vld [vmem:[#allocation2] ss:$0 sm:$0xff] }
  0x80   :  { %617 = vmatpush1.bf16.msra.mxu1 %v616_v25  ;;  %v101_v25 = vld [vmem:[%s934_s2] sm:$0x3] }
  0x81   :  { %619 = vmatprep.subr.bf16.mxu1 %v618_v28  ;;  %v105_v24 = vsub.s32 0, %v104_v23  ;;  %v109_v26 = vsub.s32 1, %v104_v23 }
  0x83   :  { %v106_v27 = vrot.slane %v101_v25, %v105_v24  ;;  %v110_v28 = vrot.slane %v101_v25, %v109_v26  ;;  %v277_v54 = vrot.slane %v272_v53, %v105_v24  ;;  %v281_v55 = vrot.slane %v272_v53, %v109_v26 }
  0x84   :  { %621 = vmatpush1.bf16.msra.mxu1 %v620_v31 }
  0x85   :  { %623 = vmatprep.subr.bf16.mxu1 %v622_v34 }
  0x88   :  { %625 = vmatpush1.bf16.msra.mxu1 %v624_v37 }
  0x89   :  { %627 = vmatprep.subr.bf16.mxu1 %v626_v40 }
  0x8c   :  { %629 = vmatpush1.bf16.msra.mxu1 %v628_v43  ;;  %v658_v43 = vpack.c.bf16 %v398_v42, %v397_v41 }
  0x8d   :  { %631 = vmatprep.subr.bf16.mxu1 %v630_v47  ;;  %v399_v47 = vld [vmem:[#allocation8 + $0xf0] sm:$0xff] }
  0x8e   :  { %659 = vmatprep.subr.bf16.mxu0 %v658_v43 }
  0x8f   :  { %661 = vmatpush3.bf16.msra.mxu0 %v660_v46 }
  0x90   :  { %633 = vmatpush1.bf16.msra.mxu1 %v632_v49  ;;  %v662_v49 = vpack.c.bf16 %v400_v48, %v399_v47 }
  0x92   :  { %663 = vmatprep.subr.bf16.mxu0 %v662_v49 }
  0x93   :  { %665 = vmatpush3.bf16.msra.mxu0 %v664_v52 }
 0x12c   :  { %v193_v29 = vpop.f32.mrb[0].mxu0 }
 0x12d   :  { %v194_v30 = vadd.f32 %v193_v29, %v106_v27  ;;  %v195_v31 = vpop.f32.mrb[1].mxu0 }
 0x12e   :  { %v196_v32 = vadd.f32 %v195_v31, %v110_v28 }
 0x130   :  { %675 = vtanh.f32 %v196_v32  ;;  %v199_v33 = vpop.f32.mrb[2].mxu0 }
 0x131   :  { %677 = vtanh.f32 %v194_v30  ;;  %v200_v34 = vadd.f32 %v199_v33, %v106_v27  ;;  %v201_v35 = vpop.f32.mrb[3].mxu0 }
 0x132   :  { %v202_v36 = vadd.f32 %v201_v35, %v110_v28 }
 0x134   :  { %679 = vtanh.f32 %v202_v36 }
 0x135   :  { %681 = vtanh.f32 %v200_v34 }
 0x13a   :  { %v676_v37 = vpop.eup %675 }
 0x13b   :  { %v678_v38 = vpop.eup %677  ;;  %348 = vmatprep.mubr.f32.mxu1 %v676_v37 }
 0x13c   :  { %349 = vmatmul.mubr.f32.vlgmr.msra.gmra.mrb[0].mxu1 %v678_v38 }
 0x13e   :  { %v680_v39 = vpop.eup %679 }
 0x13f   :  { %v682_v40 = vpop.eup %681  ;;  %354 = vmatprep.mubr.f32.mxu1 %v680_v39 }
 0x140   :  { %355 = vmatmul.mubr.f32.gmra.mrb[2].mxu1 %v682_v40 }
 0x20f   :  { %v350_v56 = vpop.f32.mrb[0].mxu1 }
 0x210   :  { %v351_v57 = vadd.f32 %v350_v56, %v277_v54  ;;  %v352_v58 = vpop.f32.mrb[1].mxu1 }
 0x211   :  { %v353_v59 = vadd.f32 %v352_v58, %v281_v55 }
 0x212   :  { %v361_v60 = vmul.f32 0.2, %v351_v57 }
 0x213   :  { %v362_v61 = vmul.f32 0.2, %v353_v59  ;;  %v356_v62 = vpop.f32.mrb[2].mxu1 }
 0x214   :  { %v357_v63 = vadd.f32 %v356_v62, %v277_v54  ;;  %v358_v0 = vpop.f32.mrb[3].mxu1  ;;  %v365_v3 = vmax.f32 %v351_v57, %v361_v60 }
 0x215   :  { %v366_v1 = vmax.f32 %v353_v59, %v362_v61  ;;  %v359_v2 = vadd.f32 %v358_v0, %v281_v55 }
 0x216   :  { %v363_v4 = vmul.f32 0.2, %v357_v63 }
 0x217   :  { %v364_v5 = vmul.f32 0.2, %v359_v2  ;;  %472 = vmatprep.mubr.f32.mxu0 %v366_v1 }
 0x218   :  { %473 = vmatmul.mubr.f32.vlgmr.msra.gmra.mrb[4].mxu0 %v365_v3  ;;  %v367_v7 = vmax.f32 %v357_v63, %v363_v4 }
 0x219   :  { %v368_v6 = vmax.f32 %v359_v2, %v364_v5 }
 0x21b   :  { %477 = vmatprep.mubr.f32.mxu0 %v368_v6 }
 0x21c   :  { %478 = vmatmul.mubr.f32.gmra.mrb[6].mxu0 %v367_v7 }
 0x2eb   :  { %v556_v8 = vpop.f32.mrb[4].mxu0 }
 0x2ec   :  { %v557_v10 = vpop.f32.mrb[5].mxu0 }
 0x2ed   :  { %v558_v11 = vadd.f32 %v557_v10, %v556_v8 }
 0x2ef   :  { %v475_v12 = vadd.f32 %v558_v11, %v521_v9  ;;  %v559_v13 = vpop.f32.mrb[6].mxu0 }
 0x2f0   :  { %v560_v14 = vpop.f32.mrb[7].mxu0 }
 0x2f1   :  { %683 = vtanh.f32 %v475_v12  ;;  %v561_v15 = vadd.f32 %v560_v14, %v559_v13 }
 0x2f3   :  { %v480_v16 = vadd.f32 %v561_v15, %v521_v9 }
 0x2f5   :  { %685 = vtanh.f32 %v480_v16 }
 0x2fb   :  { %v684_v18 = vpop.eup %683 }
 0x2fc   :  { %v492_v19 = vmul.f32 %v684_v18, %v522_v17 }
 0x2fe   :  { %494 = vadd.xlane.f32.xlu0 %v492_v19 }
 0x2ff   :  { %v686_v20 = vpop.eup %685 }
 0x300   :  { %v493_v21 = vmul.f32 %v686_v20, %v522_v17 }
 0x302   :  { %496 = vadd.xlane.f32.xlu0 %v493_v21 }
 0x38b   :  { %v495_v23 = vpop.xlane.xlu0 %494 }
 0x38c   :  { %v505_v24 = vadd.f32 %v523_v22, %v495_v23 }
 0x38e   :  { %508 = vst.msk [vmem:[%s941_s9] sm:$0xff] %vm507_vm2, %v505_v24 }
 0x38f   :  { %v497_v25 = vpop.xlane.xlu0 %496 }
 0x390   :  { %v506_v26 = vadd.f32 %v523_v22, %v497_v25 }
 0x392   :  { %509 = vst.msk [vmem:[%s941_s9 + $0x8] sm:$0xff] %vm507_vm2, %v506_v26 }
 0x393   :  { %514 = vsyncpa [#allocation4], 1 }
 0x394   :  { %515 = vsyncpa [#allocation6], 1 }
 0x395   :  { %516 = vsyncpa [#allocation9], 1 }

</bundles_post_ra>
